<compile_context>
chip_gen: v7x
topology: tpu7x:2x2x1
jax: 0.10.0
libtpu: 0.0.40
codegen_flags: <defaults>
</compile_context>

<pallas_src>
import jax
import jax.numpy as jnp
import numpy as np
from jax.experimental import pallas as pl
from jax.experimental.pallas import tpu as pltpu

LANE = 128     # TPU lane width (minor-axis tile)
SUBLANE = 8    # f32 sublane tile

_ACTIVATIONS = {
    "tanh": jnp.tanh,
    "relu": lambda v: jnp.maximum(v, 0.0),
    "softsign": lambda v: v / (1.0 + jnp.abs(v)),
    "softplus": jax.nn.softplus,
}


def _round_up(n, m):
    return ((n + m - 1) // m) * m


# ---------------------------------------------------------------------------
# Pallas kernel: fused N-layer MLP forward on one (F, TILE_B) batch tile
# (features on sublanes, batch on lanes).
# ---------------------------------------------------------------------------
def _make_kernel(activation):
    act = _ACTIVATIONS[activation]

    def ibnet_kernel(x_ref, w_ref, b_ref, o_ref):
        # x_ref: (F, TILE_B)        f32       features on sublanes, batch on lanes
        # w_ref: (n_layers, F, F)   f32/bf16  W_l^T, zero padded; VMEM-resident
        # b_ref: (n_layers, F, 1)   f32       biases, zero padded; VMEM-resident
        # o_ref: (OUT_PAD, TILE_B)  f32       lane-dense output slab
        n_layers = w_ref.shape[0]
        cdt = w_ref.dtype                         # MXU input dtype
        h = x_ref[...].astype(jnp.float32)        # (F, TILE_B)
        for l in range(n_layers):                 # static unroll (6 layers)
            z = jnp.dot(w_ref[l], h.astype(cdt),
                        preferred_element_type=jnp.float32)   # MXU, f32 acc
            h = act(z + b_ref[l])                 # bias (lane-bcast) + act, f32
        o_ref[...] = h[: o_ref.shape[0], :].astype(o_ref.dtype)

    return ibnet_kernel


# ---------------------------------------------------------------------------
# Parameter packing: one zero-padded W^T slab + one bias slab.
# Pack ONCE per parameter set and reuse the device-resident slabs (hoisted out
# of the steady-state forward path).
# ---------------------------------------------------------------------------
def pack_params(params, w_dtype=jnp.float32):
    """params: list of (W_(in,out), b_(out,)).  Returns (w_slab, b_slab)."""
    n = len(params)
    dims = [params[0][0].shape[0]] + [w.shape[1] for w, _ in params]
    F = _round_up(max(dims), SUBLANE)             # common padded feature width
    w_slab = np.zeros((n, F, F), np.float32)
    b_slab = np.zeros((n, F, 1), np.float32)
    for l, (w, b) in enumerate(params):
        d_in, d_out = w.shape
        w_slab[l, :d_out, :d_in] = np.asarray(w, np.float32).T   # store W^T
        b_slab[l, :d_out, 0] = np.asarray(b, np.float32)
    return jnp.asarray(w_slab, dtype=w_dtype), jnp.asarray(b_slab, jnp.float32)


def _choose_tile_b(B, tile_b):
    """Batch tile (multiple of 128); >= 2 grid steps once B >= 256 (v7x cores)."""
    B128 = _round_up(B, LANE)
    t = max(LANE, _round_up(min(tile_b, B128), LANE))
    if B128 >= 2 * LANE and t >= B128:
        t = _round_up(B128 // 2, LANE)
    return t


# ---------------------------------------------------------------------------
# Wrapper
# ---------------------------------------------------------------------------
def ibnet_forward(x, w_slab, b_slab, *, num_classes, activation="tanh",
                  tile_b=2048):
    """x: (B, d_in) float32; w_slab/b_slab: output of pack_params."""
    B, d_in = x.shape
    n_layers, F, _ = w_slab.shape
    if d_in > F:
        raise ValueError("input width exceeds packed feature width")
    OUT_PAD = _round_up(num_classes, SUBLANE)

    TILE_B = _choose_tile_b(B, tile_b)
    B_pad = _round_up(B, TILE_B)

    # Transposed, lane-dense input: features on sublanes, batch on lanes.
    # (A pad of a (16, B_pad) array -- no full-slab zero-fill + update-slice.)
    x_t = jnp.pad(x.astype(jnp.float32).T, ((0, F - d_in), (0, B_pad - B)))

    grid = (B_pad // TILE_B,)

    # Padded (executed) work, so XLA schedules this call realistically.
    flops = int(2 * n_layers * F * F * B_pad)
    transcendentals = int(n_layers * F * B_pad)
    bytes_accessed = int(
        x_t.size * 4
        + w_slab.size * w_slab.dtype.itemsize
        + b_slab.size * 4
        + OUT_PAD * B_pad * 4
    )

    out_t = pl.pallas_call(
        _make_kernel(activation),
        out_shape=jax.ShapeDtypeStruct((OUT_PAD, B_pad), jnp.float32),
        grid=grid,
        in_specs=[
            # batch tile of transposed activations
            pl.BlockSpec((F, TILE_B), lambda i: (0, i)),
            # parameter slabs: constant block index -> stay VMEM-resident
            pl.BlockSpec((n_layers, F, F), lambda i: (0, 0, 0)),
            pl.BlockSpec((n_layers, F, 1), lambda i: (0, 0, 0)),
        ],
        out_specs=pl.BlockSpec((OUT_PAD, TILE_B), lambda i: (0, i)),
        compiler_params=pltpu.CompilerParams(
            dimension_semantics=("parallel",)),   # v7x: shard batch over 2 TCs
        cost_estimate=pl.CostEstimate(
            flops=flops,
            transcendentals=transcendentals,
            bytes_accessed=bytes_accessed),
    )(x_t, w_slab, b_slab)

    # Strip feature/batch padding and restore (B, num_classes) outside the
    # kernel (keeps the in-kernel store lane-dense / unmasked).
    return out_t[:num_classes, :B].T


# ---------------------------------------------------------------------------
# Deterministic parameter init (mirrors init_weights:
#   W ~ Normal(0, 1/sqrt(out_features)), b = 0 ; stored as (in, out)).
# ---------------------------------------------------------------------------
def init_params(key, layer_dims):
    params = []
    for i in range(len(layer_dims) - 1):
        d_in, d_out = layer_dims[i], layer_dims[i + 1]
        key, sub = jax.random.split(key)
        w = jax.random.normal(sub, (d_in, d_out), dtype=jnp.float32) / np.sqrt(float(d_out))
        b = jnp.zeros((d_out,), dtype=jnp.float32)
        params.append((w, b))
    return params


# Pure-JAX reference (activation after every layer, including the last, as in
# the PyTorch module where layer6 = Sequential(Linear, act_fun)).
def ibnet_ref(x, params, activation="tanh"):
    act = _ACTIVATIONS[activation]
    h = x
    for w, b in params:
        h = act(h @ w + b)
    return h


if __name__ == "__main__":
    cfg = {"ACTIVATION": "tanh", "layersizes": [10, 7, 5, 4, 3], "NUM_CLASSES": 2}
    layer_dims = [12] + cfg["layersizes"] + [cfg["NUM_CLASSES"]]

    key = jax.random.PRNGKey(0)
    key, pkey, xkey, xkey2 = jax.random.split(key, 4)

    params = init_params(pkey, layer_dims)

    # Pack once (hoisted out of the forward path); slabs live on device.
    w32, b32 = pack_params(params, jnp.float32)

    fwd = jax.jit(ibnet_forward,
                  static_argnames=("num_classes", "activation", "tile_b"))

    # Small batch (single grid step), exact f32 path.
    x = jax.random.normal(xkey, (8, 12), dtype=jnp.float32)
    out = jax.block_until_ready(
        fwd(x, w32, b32, num_classes=cfg["NUM_CLASSES"],
            activation=cfg["ACTIVATION"]))
    ref = ibnet_ref(x, params, cfg["ACTIVATION"])
    np.testing.assert_allclose(np.asarray(out), np.asarray(ref), rtol=1e-5, atol=1e-5)

    # Larger, non-multiple batch exercises the 2-step parallel grid + padding.
    x_big = jax.random.normal(xkey2, (1000, 12), dtype=jnp.float32)
    out_big = jax.block_until_ready(
        fwd(x_big, w32, b32, num_classes=cfg["NUM_CLASSES"],
            activation=cfg["ACTIVATION"]))
    ref_big = ibnet_ref(x_big, params, cfg["ACTIVATION"])
    np.testing.assert_allclose(np.asarray(out_big), np.asarray(ref_big),
                               rtol=1e-5, atol=1e-5)

    # bf16 MXU fast path (weights in bf16, x cast only at the MXU operand,
    # f32 accumulation): relaxed tolerance vs the f32 reference.
    wbf, bbf = pack_params(params, jnp.bfloat16)
    out_bf = jax.block_until_ready(
        fwd(x_big, wbf, bbf, num_classes=cfg["NUM_CLASSES"],
            activation=cfg["ACTIVATION"]))
    np.testing.assert_allclose(np.asarray(out_bf), np.asarray(ref_big),
                               rtol=5e-2, atol=5e-2)

    # TODO(synk): IBnet.report / get_accuracy (file I/O, pickling, grad stats)
    # are host-side utilities, not part of forward, and are not ported.
    print("KERNEL_OK")
</pallas_src>

<mosaic_0001>
module attributes {stable_mosaic.version = 11 : i64} {
  func.func @ibnet_kernel(%arg0: i32, %arg1: memref<16x128xf32, #tpu.memory_space<vmem>>, %arg2: memref<6x16x16xf32, #tpu.memory_space<vmem>>, %arg3: memref<6x16x1xf32, #tpu.memory_space<vmem>>, %arg4: memref<8x128xf32, #tpu.memory_space<vmem>>) attributes {dimension_semantics = [#tpu.dimension_semantics<parallel>], iteration_bounds = array<i64: 1>, scalar_prefetch = 0 : i64, scratch_operands = 0 : i64, tpu.core_type = #tpu.core_type<tc>, window_params = [{transform_indices = @transform_0, window_bounds = array<i64: 16, 128>}, {pipeline_mode = #tpu.pipeline_mode<synchronous>, transform_indices = @transform_1, window_bounds = array<i64: 6, 16, 16>}, {pipeline_mode = #tpu.pipeline_mode<synchronous>, transform_indices = @transform_2, window_bounds = array<i64: 6, 16, 1>}, {transform_indices = @transform_3, window_bounds = array<i64: 8, 128>}]} {
    %c0 = arith.constant 0 : index
    %c0_0 = arith.constant 0 : index
    %0 = vector.load %arg1[%c0, %c0_0] : memref<16x128xf32, #tpu.memory_space<vmem>>, vector<16x128xf32>
    %c0_1 = arith.constant 0 : index
    %c0_2 = arith.constant 0 : index
    %c0_3 = arith.constant 0 : index
    %1 = vector.load %arg2[%c0_1, %c0_2, %c0_3] : memref<6x16x16xf32, #tpu.memory_space<vmem>>, vector<1x16x16xf32>
    %2 = vector.shape_cast %1 : vector<1x16x16xf32> to vector<16x16xf32>
    %cst = arith.constant dense<0.000000e+00> : vector<16x128xf32>
    %3 = tpu.matmul %2, %0, %cst {dimension_numbers = #tpu.dot_dimension_numbers<[1], [0], [0], [1], [0, 0, 1, 1], [], []>} : vector<16x16xf32>, vector<16x128xf32>, vector<16x128xf32> -> vector<16x128xf32>
    %c0_4 = arith.constant 0 : index
    %c0_5 = arith.constant 0 : index
    %c0_6 = arith.constant 0 : index
    %4 = vector.load %arg3[%c0_4, %c0_5, %c0_6] : memref<6x16x1xf32, #tpu.memory_space<vmem>>, vector<1x16x1xf32>
    %5 = vector.shape_cast %4 : vector<1x16x1xf32> to vector<16x1xf32>
    %6 = vector.broadcast %5 : vector<16x1xf32> to vector<16x128xf32>
    %7 = arith.addf %3, %6 : vector<16x128xf32>
    %8 = math.tanh %7 : vector<16x128xf32>
    %c1 = arith.constant 1 : index
    %c0_7 = arith.constant 0 : index
    %c0_8 = arith.constant 0 : index
    %9 = vector.load %arg2[%c1, %c0_7, %c0_8] : memref<6x16x16xf32, #tpu.memory_space<vmem>>, vector<1x16x16xf32>
    %10 = vector.shape_cast %9 : vector<1x16x16xf32> to vector<16x16xf32>
    %cst_9 = arith.constant dense<0.000000e+00> : vector<16x128xf32>
    %11 = tpu.matmul %10, %8, %cst_9 {dimension_numbers = #tpu.dot_dimension_numbers<[1], [0], [0], [1], [0, 0, 1, 1], [], []>} : vector<16x16xf32>, vector<16x128xf32>, vector<16x128xf32> -> vector<16x128xf32>
    %c1_10 = arith.constant 1 : index
    %c0_11 = arith.constant 0 : index
    %c0_12 = arith.constant 0 : index
    %12 = vector.load %arg3[%c1_10, %c0_11, %c0_12] : memref<6x16x1xf32, #tpu.memory_space<vmem>>, vector<1x16x1xf32>
    %13 = vector.shape_cast %12 : vector<1x16x1xf32> to vector<16x1xf32>
    %14 = vector.broadcast %13 : vector<16x1xf32> to vector<16x128xf32>
    %15 = arith.addf %11, %14 : vector<16x128xf32>
    %16 = math.tanh %15 : vector<16x128xf32>
    %c2 = arith.constant 2 : index
    %c0_13 = arith.constant 0 : index
    %c0_14 = arith.constant 0 : index
    %17 = vector.load %arg2[%c2, %c0_13, %c0_14] : memref<6x16x16xf32, #tpu.memory_space<vmem>>, vector<1x16x16xf32>
    %18 = vector.shape_cast %17 : vector<1x16x16xf32> to vector<16x16xf32>
    %cst_15 = arith.constant dense<0.000000e+00> : vector<16x128xf32>
    %19 = tpu.matmul %18, %16, %cst_15 {dimension_numbers = #tpu.dot_dimension_numbers<[1], [0], [0], [1], [0, 0, 1, 1], [], []>} : vector<16x16xf32>, vector<16x128xf32>, vector<16x128xf32> -> vector<16x128xf32>
    %c2_16 = arith.constant 2 : index
    %c0_17 = arith.constant 0 : index
    %c0_18 = arith.constant 0 : index
    %20 = vector.load %arg3[%c2_16, %c0_17, %c0_18] : memref<6x16x1xf32, #tpu.memory_space<vmem>>, vector<1x16x1xf32>
    %21 = vector.shape_cast %20 : vector<1x16x1xf32> to vector<16x1xf32>
    %22 = vector.broadcast %21 : vector<16x1xf32> to vector<16x128xf32>
    %23 = arith.addf %19, %22 : vector<16x128xf32>
    %24 = math.tanh %23 : vector<16x128xf32>
    %c3 = arith.constant 3 : index
    %c0_19 = arith.constant 0 : index
    %c0_20 = arith.constant 0 : index
    %25 = vector.load %arg2[%c3, %c0_19, %c0_20] : memref<6x16x16xf32, #tpu.memory_space<vmem>>, vector<1x16x16xf32>
    %26 = vector.shape_cast %25 : vector<1x16x16xf32> to vector<16x16xf32>
    %cst_21 = arith.constant dense<0.000000e+00> : vector<16x128xf32>
    %27 = tpu.matmul %26, %24, %cst_21 {dimension_numbers = #tpu.dot_dimension_numbers<[1], [0], [0], [1], [0, 0, 1, 1], [], []>} : vector<16x16xf32>, vector<16x128xf32>, vector<16x128xf32> -> vector<16x128xf32>
    %c3_22 = arith.constant 3 : index
    %c0_23 = arith.constant 0 : index
    %c0_24 = arith.constant 0 : index
    %28 = vector.load %arg3[%c3_22, %c0_23, %c0_24] : memref<6x16x1xf32, #tpu.memory_space<vmem>>, vector<1x16x1xf32>
    %29 = vector.shape_cast %28 : vector<1x16x1xf32> to vector<16x1xf32>
    %30 = vector.broadcast %29 : vector<16x1xf32> to vector<16x128xf32>
    %31 = arith.addf %27, %30 : vector<16x128xf32>
    %32 = math.tanh %31 : vector<16x128xf32>
    %c4 = arith.constant 4 : index
    %c0_25 = arith.constant 0 : index
    %c0_26 = arith.constant 0 : index
    %33 = vector.load %arg2[%c4, %c0_25, %c0_26] : memref<6x16x16xf32, #tpu.memory_space<vmem>>, vector<1x16x16xf32>
    %34 = vector.shape_cast %33 : vector<1x16x16xf32> to vector<16x16xf32>
    %cst_27 = arith.constant dense<0.000000e+00> : vector<16x128xf32>
    %35 = tpu.matmul %34, %32, %cst_27 {dimension_numbers = #tpu.dot_dimension_numbers<[1], [0], [0], [1], [0, 0, 1, 1], [], []>} : vector<16x16xf32>, vector<16x128xf32>, vector<16x128xf32> -> vector<16x128xf32>
    %c4_28 = arith.constant 4 : index
    %c0_29 = arith.constant 0 : index
    %c0_30 = arith.constant 0 : index
    %36 = vector.load %arg3[%c4_28, %c0_29, %c0_30] : memref<6x16x1xf32, #tpu.memory_space<vmem>>, vector<1x16x1xf32>
    %37 = vector.shape_cast %36 : vector<1x16x1xf32> to vector<16x1xf32>
    %38 = vector.broadcast %37 : vector<16x1xf32> to vector<16x128xf32>
    %39 = arith.addf %35, %38 : vector<16x128xf32>
    %40 = math.tanh %39 : vector<16x128xf32>
    %c5 = arith.constant 5 : index
    %c0_31 = arith.constant 0 : index
    %c0_32 = arith.constant 0 : index
    %41 = vector.load %arg2[%c5, %c0_31, %c0_32] : memref<6x16x16xf32, #tpu.memory_space<vmem>>, vector<1x16x16xf32>
    %42 = vector.shape_cast %41 : vector<1x16x16xf32> to vector<16x16xf32>
    %cst_33 = arith.constant dense<0.000000e+00> : vector<16x128xf32>
    %43 = tpu.matmul %42, %40, %cst_33 {dimension_numbers = #tpu.dot_dimension_numbers<[1], [0], [0], [1], [0, 0, 1, 1], [], []>} : vector<16x16xf32>, vector<16x128xf32>, vector<16x128xf32> -> vector<16x128xf32>
    %c5_34 = arith.constant 5 : index
    %c0_35 = arith.constant 0 : index
    %c0_36 = arith.constant 0 : index
    %44 = vector.load %arg3[%c5_34, %c0_35, %c0_36] : memref<6x16x1xf32, #tpu.memory_space<vmem>>, vector<1x16x1xf32>
    %45 = vector.shape_cast %44 : vector<1x16x1xf32> to vector<16x1xf32>
    %46 = vector.broadcast %45 : vector<16x1xf32> to vector<16x128xf32>
    %47 = arith.addf %43, %46 : vector<16x128xf32>
    %48 = math.tanh %47 : vector<16x128xf32>
    %49 = vector.extract_strided_slice %48 {offsets = [0, 0], sizes = [8, 128], strides = [1, 1]} : vector<16x128xf32> to vector<8x128xf32>
    %c0_37 = arith.constant 0 : index
    %c0_38 = arith.constant 0 : index
    %50 = vector.load %arg4[%c0_37, %c0_38] : memref<8x128xf32, #tpu.memory_space<vmem>>, vector<8x128xf32>
    tpu.vector_store %arg4[%c0_37, %c0_38], %49 {strides = array<i32>} : memref<8x128xf32, #tpu.memory_space<vmem>>, vector<8x128xf32>,
    return
  }
  func.func @transform_0(%arg0: i32) -> (i32, i32) {
    %c0_i32 = arith.constant 0 : i32
    %c0_i32_0 = arith.constant 0 : i32
    return %c0_i32, %arg0 : i32, i32
  }
  func.func @transform_1(%arg0: i32) -> (i32, i32, i32) {
    %c0_i32 = arith.constant 0 : i32
    %c0_i32_0 = arith.constant 0 : i32
    %c0_i32_1 = arith.constant 0 : i32
    %c0_i32_2 = arith.constant 0 : i32
    return %c0_i32, %c0_i32_0, %c0_i32_1 : i32, i32, i32
  }
  func.func @transform_2(%arg0: i32) -> (i32, i32, i32) {
    %c0_i32 = arith.constant 0 : i32
    %c0_i32_0 = arith.constant 0 : i32
    %c0_i32_1 = arith.constant 0 : i32
    %c0_i32_2 = arith.constant 0 : i32
    return %c0_i32, %c0_i32_0, %c0_i32_1 : i32, i32, i32
  }
  func.func @transform_3(%arg0: i32) -> (i32, i32) {
    %c0_i32 = arith.constant 0 : i32
    %c0_i32_0 = arith.constant 0 : i32
    return %c0_i32, %arg0 : i32, i32
  }
}

</mosaic_0001>

<bundles_post_ra>
// kernel: ibnet_forward.1
= control target key start
LH: loop header
LB: loop body
LE: loop exit
PB: predicated region body
PF: predicated region fallthrough
CT: control target
= control target key end

     0   :  { %vm30_vm0 = vcmask 130048   ;;  %v758_v3 = vmov 0   ;;  %s869_s0 = inlined_call_operand.vmem [shape: f32[16,128], index: 0, kind: input, shape index: {}]   ;;  %s870_s1 = inlined_call_operand.vmem [shape: f32[6,16,16], index: 1, kind: input, shape index: {}]   ;;  %s871_s2 = inlined_call_operand.vmem [shape: f32[6,16,1], index: 2, kind: input, shape index: {}]   ;;  %s872_s3 = inlined_call_operand.vmem [shape: f32[8,128], index: 3, kind: output, shape index: {}]  }
   0x1   :  { %v14_v0 = vld [vmem:[%s869_s0] sm:$0xff]  ;;  %v15_v1 = vld [vmem:[%s869_s0 + $0x8] sm:$0xff]  ;;  %734 = vset.pattern.permute.xlu0 %v758_v3  ;;  %735 = vset.pattern.permute.xlu1 %v758_v3  ;;  %v627_v9 = vld [vmem:[%s871_s2 + $0x30] sm:$0xff] }
   0x2   :  { %v16_v2 = vld [vmem:[%s870_s1] sm:$0xff]  ;;  %v709_v4 = vpack.c.bf16 %v15_v1, %v14_v0  ;;  %v19_v6 = vld [vmem:[%s871_s2 + $0x8] sm:$0xff]  ;;  %v639_v11 = vld [vmem:[%s871_s2 + $0x50] sm:$0xff] }
   0x3   :  { %671 = vmatprep.mubr.msk.f32.mxu0 %vm30_vm0, %v16_v2  ;;  %v18_v5 = vld [vmem:[%s871_s2] sm:$0xff]  ;;  %v17_v7 = vld [vmem:[%s870_s1 + $0x8] sm:$0xff]  ;;  %v613_v12 = vld [vmem:[%s870_s1 + $0x10] sm:$0xff] }
   0x4   :  { %22 = vperm.xlu0 %734, %v18_v5   ;;  %710 = vmatprep.subr.bf16.mxu0 %v709_v4  ;;  %v621_v8 = vld [vmem:[%s871_s2 + $0x20] sm:$0xff]  ;;  %v615_v13 = vld [vmem:[%s871_s2 + $0x10] sm:$0xff]  ;;  %v616_v14 = vld [vmem:[%s871_s2 + $0x18] sm:$0xff] }
   0x5   :  { %712 = vmatpush3.bf16.msra.mxu0 %v709_v4  ;;  %v633_v10 = vld [vmem:[%s871_s2 + $0x40] sm:$0xff]  ;;  %678 = vmatprep.mubr.msk.f32.mxu1 %vm30_vm0, %v613_v12  ;;  %v622_v15 = vld [vmem:[%s871_s2 + $0x28] sm:$0xff]  ;;  %v628_v16 = vld [vmem:[%s871_s2 + $0x38] sm:$0xff] }
   0x6   :  { %122 = vperm.xlu1 %735, %v615_v13   ;;  %v634_v17 = vld [vmem:[%s871_s2 + $0x48] sm:$0xff]  ;;  %v614_v27 = vld [vmem:[%s870_s1 + $0x18] sm:$0xff]  ;;  %v619_v28 = vld [vmem:[%s870_s1 + $0x20] sm:$0xff] }
   0x7   :  { %v620_v38 = vld [vmem:[%s870_s1 + $0x28] sm:$0xff]  ;;  %v625_v39 = vld [vmem:[%s870_s1 + $0x30] sm:$0xff]  ;;  %v626_v49 = vld [vmem:[%s870_s1 + $0x38] sm:$0xff] }
   0x8   :  { %27 = vperm.xlu0 %734, %v19_v6   ;;  %672 = vmatmul.mubr.msk.f32.vlgmr.msra.gmra.mrb[0].mxu0 %vm30_vm0, %v17_v7  ;;  %v631_v50 = vld [vmem:[%s870_s1 + $0x40] sm:$0xff]  ;;  %v632_v60 = vld [vmem:[%s870_s1 + $0x48] sm:$0xff]  ;;  %v637_v61 = vld [vmem:[%s870_s1 + $0x50] sm:$0xff] }
   0x9   :  { %685 = vmatprep.mubr.msk.f32.mxu0 %vm30_vm0, %v619_v28  ;;  %v638_v7 = vld [vmem:[%s870_s1 + $0x58] sm:$0xff] }
   0xa   :  { %127 = vperm.xlu1 %735, %v616_v14  }
   0xc   :  { %221 = vperm.xlu0 %734, %v621_v8  }
   0xe   :  { %226 = vperm.xlu1 %735, %v622_v15  }
  0x10   :  { %320 = vperm.xlu0 %734, %v627_v9  }
  0x12   :  { %325 = vperm.xlu1 %735, %v628_v16  }
  0x14   :  { %419 = vperm.xlu0 %734, %v633_v10  }
  0x16   :  { %424 = vperm.xlu1 %735, %v634_v17  }
  0x18   :  { %518 = vperm.xlu0 %734, %v639_v11  }
  0x83   :  { %v23_v18 = vpop.permute.xlu0 %22 }
  0x85   :  { %v123_v29 = vpop.permute.xlu1 %122 }
  0x87   :  { %v28_v19 = vpop.permute.xlu0 %27 }
  0x89   :  { %v128_v30 = vpop.permute.xlu1 %127 }
  0x8b   :  { %v222_v42 = vpop.permute.xlu0 %221 }
  0x8d   :  { %v227_v40 = vpop.permute.xlu1 %226 }
  0x8f   :  { %v321_v53 = vpop.permute.xlu0 %320 }
  0x91   :  { %v326_v51 = vpop.permute.xlu1 %325 }
  0x93   :  { %v420_v0 = vpop.permute.xlu0 %419 }
  0x95   :  { %v425_v62 = vpop.permute.xlu1 %424 }
  0x97   :  { %v519_v9 = vpop.permute.xlu0 %518 }
  0xdb   :  { %v673_v20 = vpop.f32.mrb[0].mxu0 }
  0xdc   :  { %v109_v21 = vadd.f32 %v673_v20, %v28_v19  ;;  %v103_v22 = vpop.f32.mrb[1].mxu0 }
  0xdd   :  { %v104_v23 = vadd.f32 %v103_v22, %v23_v18 }
  0xde   :  { %736 = vtanh.f32 %v109_v21 }
  0xdf   :  { %738 = vtanh.f32 %v104_v23 }
  0xe8   :  { %v737_v24 = vpop.eup %736 }
  0xe9   :  { %v739_v25 = vpop.eup %738 }
  0xea   :  { %v713_v26 = vpack.c.bf16 %v737_v24, %v739_v25 }
  0xec   :  { %714 = vmatprep.subr.bf16.mxu1 %v713_v26 }
  0xed   :  { %716 = vmatpush3.bf16.msra.mxu1 %v713_v26 }
  0xf0   :  { %679 = vmatmul.mubr.msk.f32.vlgmr.msra.gmra.mrb[0].mxu1 %vm30_vm0, %v614_v27 }
  0xf1   :  { %692 = vmatprep.mubr.msk.f32.mxu1 %vm30_vm0, %v625_v39 }
 0x1c3   :  { %v680_v31 = vpop.f32.mrb[0].mxu1 }
 0x1c4   :  { %v208_v32 = vadd.f32 %v680_v31, %v128_v30  ;;  %v202_v33 = vpop.f32.mrb[1].mxu1 }
 0x1c5   :  { %v203_v34 = vadd.f32 %v202_v33, %v123_v29 }
 0x1c6   :  { %740 = vtanh.f32 %v208_v32 }
 0x1c7   :  { %742 = vtanh.f32 %v203_v34 }
 0x1d0   :  { %v741_v35 = vpop.eup %740 }
 0x1d1   :  { %v743_v36 = vpop.eup %742 }
 0x1d2   :  { %v717_v37 = vpack.c.bf16 %v741_v35, %v743_v36 }
 0x1d4   :  { %718 = vmatprep.subr.bf16.mxu0 %v717_v37 }
 0x1d5   :  { %720 = vmatpush3.bf16.msra.mxu0 %v717_v37 }
 0x1d8   :  { %686 = vmatmul.mubr.msk.f32.vlgmr.msra.gmra.mrb[2].mxu0 %vm30_vm0, %v620_v38 }
 0x1d9   :  { %699 = vmatprep.mubr.msk.f32.mxu0 %vm30_vm0, %v631_v50 }
 0x2ab   :  { %v687_v41 = vpop.f32.mrb[2].mxu0 }
 0x2ac   :  { %v307_v43 = vadd.f32 %v687_v41, %v227_v40  ;;  %v301_v44 = vpop.f32.mrb[3].mxu0 }
 0x2ad   :  { %v302_v45 = vadd.f32 %v301_v44, %v222_v42 }
 0x2ae   :  { %744 = vtanh.f32 %v307_v43 }
 0x2af   :  { %746 = vtanh.f32 %v302_v45 }
 0x2b8   :  { %v745_v46 = vpop.eup %744 }
 0x2b9   :  { %v747_v47 = vpop.eup %746 }
 0x2ba   :  { %v721_v48 = vpack.c.bf16 %v745_v46, %v747_v47 }
 0x2bc   :  { %722 = vmatprep.subr.bf16.mxu1 %v721_v48 }
 0x2bd   :  { %724 = vmatpush3.bf16.msra.mxu1 %v721_v48 }
 0x2c0   :  { %693 = vmatmul.mubr.msk.f32.vlgmr.msra.gmra.mrb[2].mxu1 %vm30_vm0, %v626_v49 }
 0x2c1   :  { %706 = vmatprep.mubr.msk.f32.mxu1 %vm30_vm0, %v637_v61 }
 0x393   :  { %v694_v52 = vpop.f32.mrb[2].mxu1 }
 0x394   :  { %v406_v54 = vadd.f32 %v694_v52, %v326_v51  ;;  %v400_v55 = vpop.f32.mrb[3].mxu1 }
 0x395   :  { %v401_v56 = vadd.f32 %v400_v55, %v321_v53 }
 0x396   :  { %748 = vtanh.f32 %v406_v54 }
 0x397   :  { %750 = vtanh.f32 %v401_v56 }
 0x3a0   :  { %v749_v57 = vpop.eup %748 }
 0x3a1   :  { %v751_v58 = vpop.eup %750 }
 0x3a2   :  { %v725_v59 = vpack.c.bf16 %v749_v57, %v751_v58 }
 0x3a4   :  { %726 = vmatprep.subr.bf16.mxu0 %v725_v59 }
 0x3a5   :  { %728 = vmatpush3.bf16.msra.mxu0 %v725_v59 }
 0x3a8   :  { %700 = vmatmul.mubr.msk.f32.vlgmr.msra.gmra.mrb[4].mxu0 %vm30_vm0, %v632_v60 }
 0x47b   :  { %v701_v63 = vpop.f32.mrb[4].mxu0 }
 0x47c   :  { %v505_v1 = vadd.f32 %v701_v63, %v425_v62  ;;  %v499_v2 = vpop.f32.mrb[5].mxu0 }
 0x47d   :  { %v500_v3 = vadd.f32 %v499_v2, %v420_v0 }
 0x47e   :  { %752 = vtanh.f32 %v505_v1 }
 0x47f   :  { %754 = vtanh.f32 %v500_v3 }
 0x488   :  { %v753_v4 = vpop.eup %752 }
 0x489   :  { %v755_v5 = vpop.eup %754 }
 0x48a   :  { %v729_v6 = vpack.c.bf16 %v753_v4, %v755_v5 }
 0x48c   :  { %730 = vmatprep.subr.bf16.mxu1 %v729_v6 }
 0x48d   :  { %732 = vmatpush3.bf16.msra.mxu1 %v729_v6 }
 0x490   :  { %707 = vmatmul.mubr.msk.f32.vlgmr.msra.gmra.mrb[4].mxu1 %vm30_vm0, %v638_v7 }
 0x563   :  { %v708_v8 = vpop.f32.mrb[4].mxu1 }
 0x564   :  { %v597_v10 = vpop.f32.mrb[5].mxu1 }
 0x565   :  { %v598_v11 = vadd.f32 %v597_v10, %v519_v9 }
 0x567   :  { %756 = vtanh.f32 %v598_v11 }
 0x571   :  { %v757_v12 = vpop.eup %756 }
 0x572   :  { %606 = vst [vmem:[%s872_s3] sm:$0xff] %v757_v12 }

</bundles_post_ra>
